<compile_context>
chip_gen: v6e
topology: v6e:2x2x1
jax: 0.10.0
libtpu: 0.0.40
codegen_flags: <defaults>
</compile_context>

<pallas_src>
import functools

import jax
import jax.numpy as jnp
from jax.experimental import pallas as pl
from jax.experimental.pallas import tpu as pltpu

_GIOU_EPS = 1e-7


def _matcher_cost_kernel(xgt_ref, boxes_ref, tgt_ref, cost_ref,
                         *, w_class, w_bbox, w_giou, focal_alpha):
    # Block shapes (per grid step, TB frames on the lane axis):
    #   xgt_ref   : (NQ, TB) f32   GT-class logit per (query, frame) (gathered in the wrapper)
    #   boxes_ref : (4, NQ, TB) f32 predicted boxes as coordinate planes (cx, cy, w, h)
    #   tgt_ref   : (4, TB) f32    GT box coordinate planes
    #   cost_ref  : (NQ, TB) f32   matching cost

    # ---- focal class cost (gamma == 2) via stable log-sigmoid ----
    # log p = -log(1 + exp(-x)),  log q = log p - x,  p = exp(log p)
    # (clamp keeps exp(-x) finite for pathologically saturated logits; no-op for normal inputs)
    x = jnp.clip(xgt_ref[...], -50.0, 50.0)                             # (NQ, TB)
    e = jnp.exp(-x)
    s = -jnp.log(1.0 + e)                                               # log sigmoid(x)
    p = jnp.exp(s)
    q = 1.0 - p
    neg = (1.0 - focal_alpha) * (p * p) * (x - s)                       # == -(log q)
    pos = focal_alpha * (q * q) * (-s)                                  # == -(log p)
    cost_class = pos - neg                                              # (NQ, TB)

    # ---- L1 bbox cost (cdist p=1 on cxcywh) on lane-dense coordinate planes ----
    cx, cy, w, h = boxes_ref[0], boxes_ref[1], boxes_ref[2], boxes_ref[3]   # (NQ, TB)
    tgt = tgt_ref[...]                                                      # (4, TB)
    tcx, tcy, tw, th = tgt[0:1], tgt[1:2], tgt[2:3], tgt[3:4]               # (1, TB)
    cost_bbox = (jnp.abs(cx - tcx) + jnp.abs(cy - tcy) +
                 jnp.abs(w - tw) + jnp.abs(h - th))                     # (NQ, TB)

    # ---- GIoU cost (cxcywh -> xyxy); eps guards degenerate/zero-padded boxes ----
    ox0, oy0 = cx - 0.5 * w, cy - 0.5 * h
    ox1, oy1 = cx + 0.5 * w, cy + 0.5 * h
    tx0, ty0 = tcx - 0.5 * tw, tcy - 0.5 * th
    tx1, ty1 = tcx + 0.5 * tw, tcy + 0.5 * th

    area_o = (ox1 - ox0) * (oy1 - oy0)                                  # (NQ, TB)
    area_t = (tx1 - tx0) * (ty1 - ty0)                                  # (1, TB)

    iw = jnp.maximum(jnp.minimum(ox1, tx1) - jnp.maximum(ox0, tx0), 0.0)
    ih = jnp.maximum(jnp.minimum(oy1, ty1) - jnp.maximum(oy0, ty0), 0.0)
    inter = iw * ih
    union = area_o + area_t - inter
    iou = inter * pl.reciprocal(union + _GIOU_EPS, approx=True)

    ew = jnp.maximum(jnp.maximum(ox1, tx1) - jnp.minimum(ox0, tx0), 0.0)
    eh = jnp.maximum(jnp.maximum(oy1, ty1) - jnp.minimum(oy0, ty0), 0.0)
    enclose = ew * eh
    giou = iou - (enclose - union) * pl.reciprocal(enclose + _GIOU_EPS, approx=True)
    cost_giou = -giou                                                   # (NQ, TB)

    cost_ref[...] = (w_bbox * cost_bbox + w_class * cost_class +
                     w_giou * cost_giou).astype(cost_ref.dtype)


def matcher_costs(logits, boxes, tgt_box, tgt_ids, *,
                  cost_class=1.0, cost_bbox=1.0, cost_giou=1.0,
                  focal_alpha=0.25, block_t=512):
    """Cost matrix for all frames.  Returns (T, NQ) float32.

    logits : (T, NQ, NC) float (f32 or bf16 -- read once by the wrapper-side gather)
    boxes  : (T, NQ, 4)  cxcywh predictions
    tgt_box: (T, 4)      cxcywh GT box per frame
    tgt_ids: (T,)        int GT label per frame
    """
    T, NQ, NC = logits.shape

    # GT-class gather hoisted out of the kernel: single pass over the big logits stream;
    # everything downstream (pad / transpose / kernel) touches only tiny (T, NQ)-sized data.
    ids = jnp.clip(tgt_ids.astype(jnp.int32), 0, NC - 1)
    x_gt = jnp.take_along_axis(logits, ids[:, None, None], axis=-1)[..., 0]   # (T, NQ)
    x_gt = x_gt.astype(jnp.float32)

    bt = max(128, (int(block_t) // 128) * 128)
    TB = max(128, min(bt, pl.cdiv(T, 128) * 128))      # keep >=2 grid blocks when T > block_t
    T_pad = pl.cdiv(T, TB) * TB
    pad = T_pad - T
    if pad:  # only small arrays get padded (the NC-wide logits stream never does)
        x_gt = jnp.pad(x_gt, ((0, pad), (0, 0)))
        boxes = jnp.pad(boxes, ((0, pad), (0, 0), (0, 0)))
        tgt_box = jnp.pad(tgt_box, ((0, pad), (0, 0)))

    # Lane-dense layout: the blocked frame axis goes on the last (lane) dim of every operand.
    xgt_t = jnp.transpose(x_gt, (1, 0))                                  # (NQ, T_pad)
    boxes_t = jnp.transpose(boxes, (2, 1, 0)).astype(jnp.float32)        # (4, NQ, T_pad)
    tgt_t = jnp.transpose(tgt_box, (1, 0)).astype(jnp.float32)           # (4, T_pad)

    kernel = functools.partial(
        _matcher_cost_kernel,
        w_class=float(cost_class), w_bbox=float(cost_bbox), w_giou=float(cost_giou),
        focal_alpha=float(focal_alpha))

    bytes_accessed = 4 * (xgt_t.size + boxes_t.size + tgt_t.size + NQ * T_pad)
    cost_est = pl.CostEstimate(flops=int(60 * NQ * T_pad),
                               transcendentals=int(5 * NQ * T_pad),
                               bytes_accessed=int(bytes_accessed))

    cost_t = pl.pallas_call(
        kernel,
        out_shape=jax.ShapeDtypeStruct((NQ, T_pad), jnp.float32),
        grid=(T_pad // TB,),
        in_specs=[
            pl.BlockSpec((NQ, TB), lambda i: (0, i)),
            pl.BlockSpec((4, NQ, TB), lambda i: (0, 0, i)),
            pl.BlockSpec((4, TB), lambda i: (0, i)),
        ],
        out_specs=pl.BlockSpec((NQ, TB), lambda i: (0, i)),
        compiler_params=pltpu.CompilerParams(dimension_semantics=("parallel",)),
        cost_estimate=cost_est,
    )(xgt_t, boxes_t, tgt_t)

    return jnp.transpose(cost_t[:, :T])                                  # (T, NQ)


def hungarian_matcher_forward(outputs, targets, *,
                              cost_class=1.0, cost_bbox=1.0, cost_giou=1.0,
                              focal_alpha=0.25, block_t=512):
    """JAX/Pallas equivalent of HungarianMatcher.forward (jhmdb variant).

    Returns a list (len = bs*t) of (query_index, target_index) pairs, like the PyTorch module.
    """
    pred_logits = outputs["pred_logits"]          # [bs, t, nq, nc]
    pred_boxes = outputs["pred_boxes"]            # [bs, t, nq, 4]
    bs, t, nq, nc = pred_logits.shape
    T = bs * t

    logits = pred_logits.reshape(T, nq, nc)       # keep native dtype (bf16 OK)
    boxes = pred_boxes.reshape(T, nq, 4)

    tgt_bbox = jnp.concatenate([v["boxes"] for v in targets], axis=0)[:, 1:]   # [T, 4]
    tgt_ids = jnp.concatenate([v["labels"] for v in targets], axis=0)          # [T]

    C = matcher_costs(logits, boxes, tgt_bbox, tgt_ids,
                      cost_class=cost_class, cost_bbox=cost_bbox, cost_giou=cost_giou,
                      focal_alpha=focal_alpha, block_t=block_t)                # (T, NQ)

    # linear_sum_assignment on an (nq x 1) cost matrix == argmin over queries, col index 0.
    row = jnp.argmin(C, axis=1)                                                # [T]
    counts = jnp.bincount(row, length=nq)
    idx = jnp.argmax(counts).astype(jnp.int32)     # mode of matched query indices
    # TODO(synk): Python's `max(set(lst), key=lst.count)` tie-breaking is unordered; here
    # ties resolve deterministically to the smallest query index.
    idx1 = jnp.reshape(idx, (1,))
    col0 = jnp.zeros((1,), dtype=jnp.int32)
    return [(idx1, col0) for _ in range(T)]


# ------------------------- pure-JAX reference for validation -------------------------
def _ref_costs(logits, boxes, tgt_box, tgt_ids, *, w_class, w_bbox, w_giou, alpha=0.25):
    # Faithful to the PyTorch module (eps-clamped logs, exact divides).
    tgt = tgt_box[:, None, :]                                               # (T,1,4)
    cost_bbox = jnp.sum(jnp.abs(boxes - tgt), axis=-1)                      # (T,NQ)

    def to_xyxy(b):
        cx, cy, w, h = b[..., 0], b[..., 1], b[..., 2], b[..., 3]
        return jnp.stack([cx - 0.5 * w, cy - 0.5 * h, cx + 0.5 * w, cy + 0.5 * h], -1)

    ob, tb = to_xyxy(boxes), to_xyxy(tgt)
    area_o = (ob[..., 2] - ob[..., 0]) * (ob[..., 3] - ob[..., 1])
    area_t = (tb[..., 2] - tb[..., 0]) * (tb[..., 3] - tb[..., 1])
    lt = jnp.maximum(ob[..., :2], tb[..., :2])
    rb = jnp.minimum(ob[..., 2:], tb[..., 2:])
    wh = jnp.clip(rb - lt, 0.0)
    inter = wh[..., 0] * wh[..., 1]
    union = area_o + area_t - inter
    iou = inter / (union + _GIOU_EPS)
    lt2 = jnp.minimum(ob[..., :2], tb[..., :2])
    rb2 = jnp.maximum(ob[..., 2:], tb[..., 2:])
    wh2 = jnp.clip(rb2 - lt2, 0.0)
    enclose = wh2[..., 0] * wh2[..., 1]
    giou = iou - (enclose - union) / (enclose + _GIOU_EPS)
    cost_giou = -giou                                                       # (T,NQ)

    x_gt = jnp.take_along_axis(logits, tgt_ids[:, None, None].astype(jnp.int32),
                               axis=-1)[..., 0].astype(jnp.float32)         # (T,NQ)
    p = 1.0 / (1.0 + jnp.exp(-x_gt))
    q = 1.0 - p
    neg = (1.0 - alpha) * (p * p) * (-jnp.log(q + 1e-8))
    pos = alpha * (q * q) * (-jnp.log(p + 1e-8))
    cost_class = pos - neg
    return w_bbox * cost_bbox + w_class * cost_class + w_giou * cost_giou   # (T,NQ)


if __name__ == "__main__":
    key = jax.random.PRNGKey(0)
    bs, t, nq, nc = 2, 3, 8, 21          # small shapes (JHMDB: 21 classes, 8 queries)

    k1, k2, k3, k4 = jax.random.split(key, 4)
    pred_logits = jax.random.normal(k1, (bs, t, nq, nc), jnp.float32)
    # valid-ish cxcywh predictions
    cxcy = jax.random.uniform(k2, (bs, t, nq, 2), minval=0.2, maxval=0.8)
    wh = jax.random.uniform(k3, (bs, t, nq, 2), minval=0.1, maxval=0.3)
    pred_boxes = jnp.concatenate([cxcy, wh], axis=-1).astype(jnp.float32)

    # targets: one box / label per frame; box tensor has 5 cols (col 0 = frame id, dropped)
    targets = []
    for b in range(bs):
        kb1, kb2, kb3 = jax.random.split(jax.random.fold_in(k4, b), 3)
        frame_id = jnp.arange(t, dtype=jnp.float32)[:, None]
        tcxcy = jax.random.uniform(kb1, (t, 2), minval=0.3, maxval=0.7)
        twh = jax.random.uniform(kb2, (t, 2), minval=0.1, maxval=0.3)
        tboxes = jnp.concatenate([frame_id, tcxcy, twh], axis=-1).astype(jnp.float32)
        labels = jax.random.randint(kb3, (t,), 0, nc, dtype=jnp.int32)
        targets.append({"boxes": tboxes, "labels": labels})

    outputs = {"pred_logits": pred_logits, "pred_boxes": pred_boxes}

    indices = hungarian_matcher_forward(outputs, targets)
    for i_q, i_t in indices:
        jax.block_until_ready(i_q)
        jax.block_until_ready(i_t)

    # validate the Pallas cost matrix against a pure-JAX (PyTorch-faithful) reference
    T = bs * t
    logits_f = pred_logits.reshape(T, nq, nc)
    boxes_f = pred_boxes.reshape(T, nq, 4)
    tgt_bbox = jnp.concatenate([v["boxes"] for v in targets], axis=0)[:, 1:]
    tgt_ids = jnp.concatenate([v["labels"] for v in targets], axis=0)

    C = jax.block_until_ready(matcher_costs(logits_f, boxes_f, tgt_bbox, tgt_ids))
    C_ref = _ref_costs(logits_f, boxes_f, tgt_bbox, tgt_ids,
                       w_class=1.0, w_bbox=1.0, w_giou=1.0)
    # Tolerance accounts for the EUP approx-reciprocal in the GIoU divides and the eps-free
    # log-sigmoid focal formulation; argmin/matching decisions are unaffected at this scale.
    assert jnp.allclose(C, C_ref, atol=2e-3, rtol=2e-3), \
        "Pallas cost mismatch vs reference"

    print("KERNEL_OK")
</pallas_src>

<mosaic_0001>
module attributes {stable_mosaic.version = 11 : i64} {
  func.func @_matcher_cost_kernel(%arg0: i32, %arg1: memref<8x128xf32, #tpu.memory_space<vmem>>, %arg2: memref<4x8x128xf32, #tpu.memory_space<vmem>>, %arg3: memref<4x128xf32, #tpu.memory_space<vmem>>, %arg4: memref<8x128xf32, #tpu.memory_space<vmem>>) attributes {dimension_semantics = [#tpu.dimension_semantics<parallel>], iteration_bounds = array<i64: 1>, scalar_prefetch = 0 : i64, scratch_operands = 0 : i64, tpu.core_type = #tpu.core_type<tc>, window_params = [{transform_indices = @transform_0, window_bounds = array<i64: 8, 128>}, {transform_indices = @transform_1, window_bounds = array<i64: 4, 8, 128>}, {transform_indices = @transform_2, window_bounds = array<i64: 4, 128>}, {transform_indices = @transform_3, window_bounds = array<i64: 8, 128>}]} {
    %c0 = arith.constant 0 : index
    %c0_0 = arith.constant 0 : index
    %0 = vector.load %arg1[%c0, %c0_0] : memref<8x128xf32, #tpu.memory_space<vmem>>, vector<8x128xf32>
    %cst = arith.constant -5.000000e+01 : f32
    %cst_1 = arith.constant 5.000000e+01 : f32
    %1 = vector.broadcast %cst : f32 to vector<8x128xf32>
    %2 = arith.maximumf %1, %0 : vector<8x128xf32>
    %3 = vector.broadcast %cst_1 : f32 to vector<8x128xf32>
    %4 = arith.minimumf %3, %2 : vector<8x128xf32>
    %cst_2 = arith.constant 0.000000e+00 : f32
    %5 = vector.broadcast %cst_2 : f32 to vector<8x128xf32>
    %6 = arith.subf %5, %4 : vector<8x128xf32>
    %7 = math.exp %6 : vector<8x128xf32>
    %cst_3 = arith.constant 1.000000e+00 : f32
    %8 = vector.broadcast %cst_3 : f32 to vector<8x128xf32>
    %9 = arith.addf %8, %7 : vector<8x128xf32>
    %10 = math.log %9 : vector<8x128xf32>
    %cst_4 = arith.constant 0.000000e+00 : f32
    %11 = vector.broadcast %cst_4 : f32 to vector<8x128xf32>
    %12 = arith.subf %11, %10 : vector<8x128xf32>
    %13 = math.exp %12 : vector<8x128xf32>
    %cst_5 = arith.constant 1.000000e+00 : f32
    %14 = vector.broadcast %cst_5 : f32 to vector<8x128xf32>
    %15 = arith.subf %14, %13 : vector<8x128xf32>
    %16 = arith.mulf %13, %13 : vector<8x128xf32>
    %cst_6 = arith.constant 7.500000e-01 : f32
    %17 = vector.broadcast %cst_6 : f32 to vector<8x128xf32>
    %18 = arith.mulf %17, %16 : vector<8x128xf32>
    %19 = arith.subf %4, %12 : vector<8x128xf32>
    %20 = arith.mulf %18, %19 : vector<8x128xf32>
    %21 = arith.mulf %15, %15 : vector<8x128xf32>
    %cst_7 = arith.constant 2.500000e-01 : f32
    %22 = vector.broadcast %cst_7 : f32 to vector<8x128xf32>
    %23 = arith.mulf %22, %21 : vector<8x128xf32>
    %cst_8 = arith.constant 0.000000e+00 : f32
    %24 = vector.broadcast %cst_8 : f32 to vector<8x128xf32>
    %25 = arith.subf %24, %12 : vector<8x128xf32>
    %26 = arith.mulf %23, %25 : vector<8x128xf32>
    %27 = arith.subf %26, %20 : vector<8x128xf32>
    %c0_9 = arith.constant 0 : index
    %c0_10 = arith.constant 0 : index
    %c0_11 = arith.constant 0 : index
    %28 = vector.load %arg2[%c0_9, %c0_10, %c0_11] : memref<4x8x128xf32, #tpu.memory_space<vmem>>, vector<1x8x128xf32>
    %29 = vector.shape_cast %28 : vector<1x8x128xf32> to vector<8x128xf32>
    %c1 = arith.constant 1 : index
    %c0_12 = arith.constant 0 : index
    %c0_13 = arith.constant 0 : index
    %30 = vector.load %arg2[%c1, %c0_12, %c0_13] : memref<4x8x128xf32, #tpu.memory_space<vmem>>, vector<1x8x128xf32>
    %31 = vector.shape_cast %30 : vector<1x8x128xf32> to vector<8x128xf32>
    %c2 = arith.constant 2 : index
    %c0_14 = arith.constant 0 : index
    %c0_15 = arith.constant 0 : index
    %32 = vector.load %arg2[%c2, %c0_14, %c0_15] : memref<4x8x128xf32, #tpu.memory_space<vmem>>, vector<1x8x128xf32>
    %33 = vector.shape_cast %32 : vector<1x8x128xf32> to vector<8x128xf32>
    %c3 = arith.constant 3 : index
    %c0_16 = arith.constant 0 : index
    %c0_17 = arith.constant 0 : index
    %34 = vector.load %arg2[%c3, %c0_16, %c0_17] : memref<4x8x128xf32, #tpu.memory_space<vmem>>, vector<1x8x128xf32>
    %35 = vector.shape_cast %34 : vector<1x8x128xf32> to vector<8x128xf32>
    %c0_18 = arith.constant 0 : index
    %c0_19 = arith.constant 0 : index
    %36 = vector.load %arg3[%c0_18, %c0_19] : memref<4x128xf32, #tpu.memory_space<vmem>>, vector<4x128xf32>
    %37 = vector.extract_strided_slice %36 {offsets = [0, 0], sizes = [1, 128], strides = [1, 1]} : vector<4x128xf32> to vector<1x128xf32>
    %38 = vector.extract_strided_slice %36 {offsets = [1, 0], sizes = [1, 128], strides = [1, 1]} : vector<4x128xf32> to vector<1x128xf32>
    %39 = vector.extract_strided_slice %36 {offsets = [2, 0], sizes = [1, 128], strides = [1, 1]} : vector<4x128xf32> to vector<1x128xf32>
    %40 = vector.extract_strided_slice %36 {offsets = [3, 0], sizes = [1, 128], strides = [1, 1]} : vector<4x128xf32> to vector<1x128xf32>
    %41 = vector.broadcast %37 : vector<1x128xf32> to vector<8x128xf32>
    %42 = arith.subf %29, %41 : vector<8x128xf32>
    %43 = math.absf %42 : vector<8x128xf32>
    %44 = vector.broadcast %38 : vector<1x128xf32> to vector<8x128xf32>
    %45 = arith.subf %31, %44 : vector<8x128xf32>
    %46 = math.absf %45 : vector<8x128xf32>
    %47 = arith.addf %43, %46 : vector<8x128xf32>
    %48 = vector.broadcast %39 : vector<1x128xf32> to vector<8x128xf32>
    %49 = arith.subf %33, %48 : vector<8x128xf32>
    %50 = math.absf %49 : vector<8x128xf32>
    %51 = arith.addf %47, %50 : vector<8x128xf32>
    %52 = vector.broadcast %40 : vector<1x128xf32> to vector<8x128xf32>
    %53 = arith.subf %35, %52 : vector<8x128xf32>
    %54 = math.absf %53 : vector<8x128xf32>
    %55 = arith.addf %51, %54 : vector<8x128xf32>
    %cst_20 = arith.constant 5.000000e-01 : f32
    %56 = vector.broadcast %cst_20 : f32 to vector<8x128xf32>
    %57 = arith.mulf %56, %33 : vector<8x128xf32>
    %58 = arith.subf %29, %57 : vector<8x128xf32>
    %cst_21 = arith.constant 5.000000e-01 : f32
    %59 = vector.broadcast %cst_21 : f32 to vector<8x128xf32>
    %60 = arith.mulf %59, %35 : vector<8x128xf32>
    %61 = arith.subf %31, %60 : vector<8x128xf32>
    %cst_22 = arith.constant 5.000000e-01 : f32
    %62 = vector.broadcast %cst_22 : f32 to vector<8x128xf32>
    %63 = arith.mulf %62, %33 : vector<8x128xf32>
    %64 = arith.addf %29, %63 : vector<8x128xf32>
    %cst_23 = arith.constant 5.000000e-01 : f32
    %65 = vector.broadcast %cst_23 : f32 to vector<8x128xf32>
    %66 = arith.mulf %65, %35 : vector<8x128xf32>
    %67 = arith.addf %31, %66 : vector<8x128xf32>
    %cst_24 = arith.constant 5.000000e-01 : f32
    %68 = vector.broadcast %cst_24 : f32 to vector<1x128xf32>
    %69 = arith.mulf %68, %39 : vector<1x128xf32>
    %70 = arith.subf %37, %69 : vector<1x128xf32>
    %cst_25 = arith.constant 5.000000e-01 : f32
    %71 = vector.broadcast %cst_25 : f32 to vector<1x128xf32>
    %72 = arith.mulf %71, %40 : vector<1x128xf32>
    %73 = arith.subf %38, %72 : vector<1x128xf32>
    %cst_26 = arith.constant 5.000000e-01 : f32
    %74 = vector.broadcast %cst_26 : f32 to vector<1x128xf32>
    %75 = arith.mulf %74, %39 : vector<1x128xf32>
    %76 = arith.addf %37, %75 : vector<1x128xf32>
    %cst_27 = arith.constant 5.000000e-01 : f32
    %77 = vector.broadcast %cst_27 : f32 to vector<1x128xf32>
    %78 = arith.mulf %77, %40 : vector<1x128xf32>
    %79 = arith.addf %38, %78 : vector<1x128xf32>
    %80 = arith.subf %64, %58 : vector<8x128xf32>
    %81 = arith.subf %67, %61 : vector<8x128xf32>
    %82 = arith.mulf %80, %81 : vector<8x128xf32>
    %83 = arith.subf %76, %70 : vector<1x128xf32>
    %84 = arith.subf %79, %73 : vector<1x128xf32>
    %85 = arith.mulf %83, %84 : vector<1x128xf32>
    %86 = vector.broadcast %76 : vector<1x128xf32> to vector<8x128xf32>
    %87 = arith.minimumf %64, %86 : vector<8x128xf32>
    %88 = vector.broadcast %70 : vector<1x128xf32> to vector<8x128xf32>
    %89 = arith.maximumf %58, %88 : vector<8x128xf32>
    %90 = arith.subf %87, %89 : vector<8x128xf32>
    %cst_28 = arith.constant 0.000000e+00 : f32
    %91 = vector.broadcast %cst_28 : f32 to vector<8x128xf32>
    %92 = arith.maximumf %90, %91 : vector<8x128xf32>
    %93 = vector.broadcast %79 : vector<1x128xf32> to vector<8x128xf32>
    %94 = arith.minimumf %67, %93 : vector<8x128xf32>
    %95 = vector.broadcast %73 : vector<1x128xf32> to vector<8x128xf32>
    %96 = arith.maximumf %61, %95 : vector<8x128xf32>
    %97 = arith.subf %94, %96 : vector<8x128xf32>
    %cst_29 = arith.constant 0.000000e+00 : f32
    %98 = vector.broadcast %cst_29 : f32 to vector<8x128xf32>
    %99 = arith.maximumf %97, %98 : vector<8x128xf32>
    %100 = arith.mulf %92, %99 : vector<8x128xf32>
    %101 = vector.broadcast %85 : vector<1x128xf32> to vector<8x128xf32>
    %102 = arith.addf %82, %101 : vector<8x128xf32>
    %103 = arith.subf %102, %100 : vector<8x128xf32>
    %cst_30 = arith.constant 1.000000e-07 : f32
    %104 = vector.broadcast %cst_30 : f32 to vector<8x128xf32>
    %105 = arith.addf %103, %104 : vector<8x128xf32>
    %106 = tpu.reciprocal %105 {approx = true} : vector<8x128xf32> -> vector<8x128xf32>
    %107 = arith.mulf %100, %106 : vector<8x128xf32>
    %108 = vector.broadcast %76 : vector<1x128xf32> to vector<8x128xf32>
    %109 = arith.maximumf %64, %108 : vector<8x128xf32>
    %110 = vector.broadcast %70 : vector<1x128xf32> to vector<8x128xf32>
    %111 = arith.minimumf %58, %110 : vector<8x128xf32>
    %112 = arith.subf %109, %111 : vector<8x128xf32>
    %cst_31 = arith.constant 0.000000e+00 : f32
    %113 = vector.broadcast %cst_31 : f32 to vector<8x128xf32>
    %114 = arith.maximumf %112, %113 : vector<8x128xf32>
    %115 = vector.broadcast %79 : vector<1x128xf32> to vector<8x128xf32>
    %116 = arith.maximumf %67, %115 : vector<8x128xf32>
    %117 = vector.broadcast %73 : vector<1x128xf32> to vector<8x128xf32>
    %118 = arith.minimumf %61, %117 : vector<8x128xf32>
    %119 = arith.subf %116, %118 : vector<8x128xf32>
    %cst_32 = arith.constant 0.000000e+00 : f32
    %120 = vector.broadcast %cst_32 : f32 to vector<8x128xf32>
    %121 = arith.maximumf %119, %120 : vector<8x128xf32>
    %122 = arith.mulf %114, %121 : vector<8x128xf32>
    %123 = arith.subf %122, %103 : vector<8x128xf32>
    %cst_33 = arith.constant 1.000000e-07 : f32
    %124 = vector.broadcast %cst_33 : f32 to vector<8x128xf32>
    %125 = arith.addf %122, %124 : vector<8x128xf32>
    %126 = tpu.reciprocal %125 {approx = true} : vector<8x128xf32> -> vector<8x128xf32>
    %127 = arith.mulf %123, %126 : vector<8x128xf32>
    %128 = arith.subf %107, %127 : vector<8x128xf32>
    %cst_34 = arith.constant 0.000000e+00 : f32
    %129 = vector.broadcast %cst_34 : f32 to vector<8x128xf32>
    %130 = arith.subf %129, %128 : vector<8x128xf32>
    %cst_35 = arith.constant 1.000000e+00 : f32
    %131 = vector.broadcast %cst_35 : f32 to vector<8x128xf32>
    %132 = arith.mulf %131, %55 : vector<8x128xf32>
    %cst_36 = arith.constant 1.000000e+00 : f32
    %133 = vector.broadcast %cst_36 : f32 to vector<8x128xf32>
    %134 = arith.mulf %133, %27 : vector<8x128xf32>
    %135 = arith.addf %132, %134 : vector<8x128xf32>
    %cst_37 = arith.constant 1.000000e+00 : f32
    %136 = vector.broadcast %cst_37 : f32 to vector<8x128xf32>
    %137 = arith.mulf %136, %130 : vector<8x128xf32>
    %138 = arith.addf %135, %137 : vector<8x128xf32>
    %c0_38 = arith.constant 0 : index
    %c0_39 = arith.constant 0 : index
    %139 = vector.load %arg4[%c0_38, %c0_39] : memref<8x128xf32, #tpu.memory_space<vmem>>, vector<8x128xf32>
    tpu.vector_store %arg4[%c0_38, %c0_39], %138 {strides = array<i32>} : memref<8x128xf32, #tpu.memory_space<vmem>>, vector<8x128xf32>,
    return
  }
  func.func @transform_0(%arg0: i32) -> (i32, i32) {
    %c0_i32 = arith.constant 0 : i32
    %c0_i32_0 = arith.constant 0 : i32
    return %c0_i32, %arg0 : i32, i32
  }
  func.func @transform_1(%arg0: i32) -> (i32, i32, i32) {
    %c0_i32 = arith.constant 0 : i32
    %c0_i32_0 = arith.constant 0 : i32
    %c0_i32_1 = arith.constant 0 : i32
    return %c0_i32, %c0_i32_0, %arg0 : i32, i32, i32
  }
  func.func @transform_2(%arg0: i32) -> (i32, i32) {
    %c0_i32 = arith.constant 0 : i32
    %c0_i32_0 = arith.constant 0 : i32
    return %c0_i32, %arg0 : i32, i32
  }
  func.func @transform_3(%arg0: i32) -> (i32, i32) {
    %c0_i32 = arith.constant 0 : i32
    %c0_i32_0 = arith.constant 0 : i32
    return %c0_i32, %arg0 : i32, i32
  }
}

</mosaic_0001>

<bundles_post_ra>
// kernel: tpu_custom_call.1
= control target key start
LH: loop header
LB: loop body
LE: loop exit
PB: predicated region body
PF: predicated region fallthrough
CT: control target
= control target key end

     0   :  { %8 = vsyncpa [#allocation3], 0  ;;  %s368_s0 = inlined_call_operand.hbm [shape: f32[8,128], index: 0, kind: input, shape index: {}]   ;;  %s369_s1 = inlined_call_operand.hbm [shape: f32[4,8,128], index: 1, kind: input, shape index: {}]   ;;  %s370_s2 = inlined_call_operand.hbm [shape: f32[4,128], index: 2, kind: input, shape index: {}]   ;;  %s371_s3 = inlined_call_operand.hbm [shape: f32[8,128], index: 3, kind: output, shape index: {}]  }
   0x1   :  { %9 = vsyncpa [#allocation6], 0 }
   0x2   :  { %10 = vsyncpa [#allocation4], 0  ;;  %s300_s12 = smov [#allocation5]  }
   0x3   :  { %s26_s13 = sshll.u32 %s300_s12, 4  ;;  %s27_s13 = int_to_ptr.vmem [resolvable:$true] %s26_s13 }
   0x4   :  { %s222_s14 = scalar_lea.vmem %s27_s13, 512  ;;  %p227_p1 = scmp.lt.s32.totalorder %s27_s13, %s27_s13 }
   0x5   :  { %p223_p0 = scmp.ne.s32.totalorder %s27_s13, %s222_s14  ;;  %p228_p2 = scmp.lt.s32.totalorder %s222_s14, %s222_s14 }
   0x7   :  { %p229_p3 = por %p228_p2, %p227_p1 }
   0x9   :  { %p230_p4 = pnand %p229_p3, %p223_p0 }
   0xb   :  { %233 = shalt.err (!%p230_p4)
}
   0xc   :  { %s301_s15 = smov 128   ;;  %s302_s16 = smov 8  }
   0xd   :  { %32 = dma.hbm_to_vmem [thread:$0]  %s369_s1, 512, %s27_s13, [#allocation6], %s301_s15, %s301_s15, %s302_s16  }
   0xe   :  { %s303_s19 = smov [#allocation2]   ;;  %s304_s21 = smov [#allocation7]  }
   0xf   :  { %s17_s20 = sshll.u32 %s303_s19, 4  ;;  %s39_s22 = sshll.u32 %s304_s21, 4  ;;  %s18_s20 = int_to_ptr.vmem [resolvable:$true] %s17_s20  ;;  %s40_s22 = int_to_ptr.vmem [resolvable:$true] %s39_s22 }
  0x10   :  { %s242_s23 = scalar_lea.vmem %s18_s20, 128  ;;  %p247_p6 = scmp.lt.s32.totalorder %s18_s20, %s18_s20 }
  0x11   :  { %p243_p5 = scmp.ne.s32.totalorder %s18_s20, %s242_s23  ;;  %p248_p7 = scmp.lt.s32.totalorder %s242_s23, %s242_s23 }
  0x13   :  { %p249_p8 = por %p248_p7, %p247_p6 }
  0x15   :  { %p250_p9 = pnand %p249_p8, %p243_p5 }
  0x17   :  { %253 = shalt.err (!%p250_p9)
}
  0x18   :  { %20 = dma.hbm_to_vmem [thread:$0]  %s368_s0, 128, %s18_s20, [#allocation3]  }
  0x19   :  { %s262_s26 = scalar_lea.vmem %s40_s22, 64  ;;  %p267_p11 = scmp.lt.s32.totalorder %s40_s22, %s40_s22 }
  0x1a   :  { %p263_p10 = scmp.ne.s32.totalorder %s40_s22, %s262_s26  ;;  %p268_p12 = scmp.lt.s32.totalorder %s262_s26, %s262_s26 }
  0x1c   :  { %p269_p13 = por %p268_p12, %p267_p11 }
  0x1e   :  { %p270_p0 = pnand %p269_p13, %p263_p10 }
  0x20   :  { %273 = shalt.err (!%p270_p0)
}
  0x21   :  { %42 = dma.hbm_to_vmem [thread:$0]  %s370_s2, 64, %s40_s22, [#allocation6]  }
  0x22   :  { %294 = dma.done.wait [#allocation3], 128  }
  0x23   :  { %295 = vsyncadd [#allocation3], 4294967168 }
  0x24   :  { %296 = dma.done.wait [#allocation6], 576  }
  0x25   :  { %297 = vsyncadd [#allocation6], 4294966720  ;;  %v335_v0 = vld [vmem:[#allocation2] sm:$0xff]  ;;  %v338_v2 = vld [vmem:[#allocation7] sm:$0xf]  ;;  %v82_v3 = vlaneseq  ;;  %s305_s0 = smov [#allocation8]  }
  0x26   :  { %v197_v1 = vclamps-f32 %v335_v0, 50.0  ;;  %v115_v5 = vmul.f32 0.5, %v338_v2  ;;  %v343_v6 = vld [vmem:[#allocation5 + $0x10] sm:$0xff]  ;;  %v345_v8 = vld [vmem:[#allocation5 + $0x18] sm:$0xff]  ;;  %v74_v12 = vld [vmem:[#allocation5] sm:$0xff]  ;;  %s187_s2 = sshll.u32 %s305_s0, 4  ;;  %s188_s2 = int_to_ptr.vmem [resolvable:$true] %s187_s2 }
  0x27   :  { %v347_v9 = vshrl.u32 %v82_v3, 7  ;;  %v109_v10 = vmul.f32 0.5, %v343_v6  ;;  %v111_v13 = vmul.f32 0.5, %v345_v8  ;;  %v76_v14 = vld [vmem:[#allocation5 + $0x8] sm:$0xff]  ;;  %s274_s28 = scalar_lea.vmem %s188_s2, 128  ;;  %p279_p2 = scmp.lt.s32.totalorder %s188_s2, %s188_s2 }
  0x28   :  { %v55_v4 = vsub.f32 0.0, %v197_v1  ;;  %v117_v11 = vrot.slane %v115_v5, 2  ;;  %p275_p1 = scmp.ne.s32.totalorder %s188_s2, %s274_s28  ;;  %p280_p3 = scmp.lt.s32.totalorder %s274_s28, %s274_s28 }
  0x29   :  { %v84_v15 = vsub.s32 0, %v347_v9  ;;  %v90_v16 = vsub.s32 1, %v347_v9  ;;  %v110_v19 = vsub.f32 %v74_v12, %v109_v10  ;;  %v112_v20 = vsub.f32 %v76_v14, %v111_v13 }
  0x2a   :  { %v56_v7 = vmul.f32 1.442695, %v55_v4  ;;  %v119_v17 = vsub.f32 %v338_v2, %v117_v11  ;;  %v120_v18 = vadd.f32 %v117_v11, %v338_v2  ;;  %v113_v21 = vadd.f32 %v109_v10, %v74_v12  ;;  %p281_p4 = por %p280_p3, %p279_p2 }
  0x2b   :  { %v114_v22 = vadd.f32 %v111_v13, %v76_v14  ;;  %v85_v62 = vrot.slane %v338_v2, %v84_v15  ;;  %v91_v63 = vrot.slane %v338_v2, %v90_v16  ;;  %v97_v3 = vsub.s32 2, %v347_v9 }
  0x2c   :  { %204 = vpow2.f32 %v56_v7  ;;  %v124_v23 = vsub.f32 %v120_v18, %v119_v17  ;;  %v132_v24 = vrot.slane %v120_v18, %v84_v15  ;;  %v137_v25 = vrot.slane %v119_v17, %v84_v15  ;;  %p282_p5 = pnand %p281_p4, %p275_p1 }
  0x2d   :  { %v144_v26 = vrot.slane %v120_v18, %v90_v16  ;;  %v149_v27 = vrot.slane %v119_v17, %v90_v16  ;;  %v121_v33 = vsub.f32 %v113_v21, %v110_v19  ;;  %v122_v34 = vsub.f32 %v114_v22, %v112_v20 }
  0x2e   :  { %v126_v28 = vrot.slane %v124_v23, 1  ;;  %v133_v29 = vmin.f32 %v113_v21, %v132_v24  ;;  %v138_v30 = vmax.f32 %v110_v19, %v137_v25  ;;  %v163_v36 = vmax.f32 %v113_v21, %v132_v24 }
  0x2f   :  { %v145_v31 = vmin.f32 %v114_v22, %v144_v26  ;;  %v150_v32 = vmax.f32 %v112_v20, %v149_v27  ;;  %v164_v37 = vmin.f32 %v110_v19, %v137_v25  ;;  %v167_v38 = vmax.f32 %v114_v22, %v144_v26 }
  0x30   :  { %v168_v39 = vmin.f32 %v112_v20, %v149_v27  ;;  %v128_v41 = vmul.f32 %v126_v28, %v124_v23  ;;  %v139_v42 = vsub.f32 %v133_v29, %v138_v30  ;;  %v123_v46 = vmul.f32 %v122_v34, %v121_v33 }
  0x31   :  { %v151_v43 = vsub.f32 %v145_v31, %v150_v32  ;;  %v165_v44 = vsub.f32 %v163_v36, %v164_v37  ;;  %v104_v4 = vsub.s32 3, %v347_v9  ;;  %v86_v5 = vsub.f32 %v74_v12, %v85_v62 }
  0x32   :  { %v169_v45 = vsub.f32 %v167_v38, %v168_v39  ;;  %v140_v47 = vmax.f32 %v139_v42, 0.0  ;;  %v157_v49 = vrot.slane %v128_v41, %v84_v15  ;;  %v92_v7 = vsub.f32 %v76_v14, %v91_v63 }
  0x33   :  { %v152_v48 = vmax.f32 %v151_v43, 0.0  ;;  %v166_v50 = vmax.f32 %v165_v44, 0.0  ;;  %v98_v10 = vrot.slane %v338_v2, %v97_v3  ;;  %v105_v11 = vrot.slane %v338_v2, %v104_v4 }
  0x34   :  { %v170_v51 = vmax.f32 %v169_v45, 0.0  ;;  %v158_v53 = vadd.f32 %v157_v49, %v123_v46  ;;  %v87_v13 = vand.u32 2147483647, %v86_v5  ;;  %v93_v17 = vand.u32 2147483647, %v92_v7 }
  0x35   :  { %v153_v52 = vmul.f32 %v152_v48, %v140_v47  ;;  %v99_v18 = vsub.f32 %v343_v6, %v98_v10  ;;  %v106_v15 = vsub.f32 %v345_v8, %v105_v11 }
  0x36   :  { %v171_v54 = vmul.f32 %v170_v51, %v166_v50  ;;  %v94_v16 = vadd.f32 %v93_v17, %v87_v13 }
  0x37   :  { %v159_v55 = vsub.f32 %v158_v53, %v153_v52  ;;  %v100_v22 = vand.u32 2147483647, %v99_v18  ;;  %v107_v2 = vand.u32 2147483647, %v106_v15 }
  0x38   :  { %v173_v57 = vadd.f32 1e-07, %v171_v54 }
  0x39   :  { %v205_v35 = vpop.eup %204  ;;  %v160_v59 = vadd.f32 1e-07, %v159_v55  ;;  %v172_v19 = vsub.f32 %v171_v54, %v159_v55  ;;  %v101_v6 = vadd.f32 %v100_v22, %v94_v16 }
  0x3a   :  { %v58_v40 = vadd.f32 1.0, %v205_v35 }
  0x3b   :  { %v108_v8 = vadd.f32 %v107_v2, %v101_v6 }
  0x3c   :  { %206 = vlog2.f32 %v58_v40 }
  0x3d   :  { %208 = vrcp.f32 %v173_v57 }
  0x3e   :  { %210 = vrcp.f32 %v160_v59 }
  0x49   :  { %v207_v56 = vpop.eup %206 }
  0x4a   :  { %v60_v58 = vmul.f32 0.6931472, %v207_v56  ;;  %v209_v20 = vpop.eup %208 }
  0x4b   :  { %v211_v21 = vpop.eup %210  ;;  %v175_v24 = vmul.f32 %v209_v20, %v172_v19 }
  0x4c   :  { %v61_v60 = vsub.f32 0.0, %v60_v58  ;;  %v162_v25 = vmul.f32 %v211_v21, %v153_v52 }
  0x4e   :  { %v62_v61 = vmul.f32 1.442695, %v61_v60  ;;  %v67_v14 = vsub.f32 %v197_v1, %v61_v60  ;;  %v71_v28 = vsub.f32 0.0, %v61_v60  ;;  %v176_v31 = vsub.f32 %v162_v25, %v175_v24 }
  0x50   :  { %212 = vpow2.f32 %v62_v61  ;;  %v177_v34 = vsub.f32 0.0, %v176_v31 }
  0x5d   :  { %v213_v23 = vpop.eup %212 }
  0x5e   :  { %v64_v9 = vsub.f32 1.0, %v213_v23  ;;  %v65_v12 = vmul.f32 %v213_v23, %v213_v23 }
  0x60   :  { %v66_v26 = vmul.f32 0.75, %v65_v12  ;;  %v69_v27 = vmul.f32 %v64_v9, %v64_v9 }
  0x62   :  { %v68_v29 = vmul.f32 %v67_v14, %v66_v26  ;;  %v70_v30 = vmul.f32 0.25, %v69_v27 }
  0x64   :  { %v72_v32 = vmul.f32 %v71_v28, %v70_v30 }
  0x66   :  { %v73_v33 = vsub.f32 %v72_v32, %v68_v29 }
  0x68   :  { %v178_v35 = vadd.f32 %v108_v8, %v73_v33 }
  0x6a   :  { %v179_v36 = vadd.f32 %v178_v35, %v177_v34 }
  0x6c   :  { %180 = vst [vmem:[#allocation8] sm:$0xff] %v179_v36 }
  0x6d   :  { %285 = shalt.err (!%p282_p5)
}
  0x6e   :  { %190 = dma.vmem_to_hbm [thread:$0]  %s188_s2, 128, %s371_s3, [#allocation4]  }
  0x6f   :  { %298 = dma.done.wait [#allocation4], 128  }
  0x70   :  { %299 = vsyncadd [#allocation4], 4294967168 }
  0x71   :  { %194 = vsyncpa [#allocation3], 1 }
  0x72   :  { %195 = vsyncpa [#allocation6], 1 }
  0x73   :  { %196 = vsyncpa [#allocation4], 1 }

</bundles_post_ra>
